<compile_context>
chip_gen: v5e
topology: v5e:2x2
jax: 0.10.0
libtpu: 0.0.40
codegen_flags: <defaults>
</compile_context>

<pallas_src>
import functools

import jax
import jax.numpy as jnp
from jax.experimental import pallas as pl
from jax.experimental.pallas import tpu as pltpu

LANE = 128


def _loss_partials_kernel(yreg_ref, lreg_ref, reg_ref, ycla_ref, dlcla_ref, dcla_ref,
                          out_ref, *, n_valid):
    """Per-block lane-wise partial sums written to out_ref of shape (1, 8, 128):

      row 0: sum over valid positions of |lreg - y_reg|
      row 1: sum over valid positions of |reg  - y_reg|
      row 2: number of valid (non-NaN, in-range) regression labels
      row 3: sum over in-range positions of CE(lcla logits, y_cla)
      row 4: sum over in-range positions of CE(cla  logits, y_cla)
      rows 5-7: zeros (keeps the output tile a clean (8, 128))
    """
    i = pl.program_id(0)
    blk_rows, lanes = yreg_ref.shape

    # Tail mask from the true element count (no mask plane read from HBM).
    row_ids = jax.lax.broadcasted_iota(jnp.int32, (blk_rows, lanes), 0)
    lane_ids = jax.lax.broadcasted_iota(jnp.int32, (blk_rows, lanes), 1)
    gidx = (i * blk_rows + row_ids) * lanes + lane_ids
    in_bounds = gidx < n_valid

    # ---- masked-MAE partial sums (null_val = NaN semantics of masked_mae) ----
    y_reg = yreg_ref[...].astype(jnp.float32)
    valid = jnp.logical_and(in_bounds, jnp.logical_not(jnp.isnan(y_reg)))
    y_safe = jnp.where(valid, y_reg, 0.0)
    abs_l = jnp.where(valid, jnp.abs(lreg_ref[...].astype(jnp.float32) - y_safe), 0.0)
    abs_r = jnp.where(valid, jnp.abs(reg_ref[...].astype(jnp.float32) - y_safe), 0.0)

    s0 = jnp.sum(abs_l, axis=0, keepdims=True)                       # (1, 128)
    s1 = jnp.sum(abs_r, axis=0, keepdims=True)
    s2 = jnp.sum(valid.astype(jnp.float32), axis=0, keepdims=True)

    # ---- 2-class cross-entropy: lse(c0, c1) - c_sel == softplus(c_other - c_sel) ----
    # With d = c1 - c0 and label y: loss = softplus(d) if y != 1 else softplus(-d).
    sgn = jnp.where(ycla_ref[...].astype(jnp.float32) == 1.0, -1.0, 1.0)

    def ce_lane_sum(d_ref):
        z = sgn * d_ref[...].astype(jnp.float32)
        sp = jnp.maximum(z, 0.0) + jnp.log(1.0 + jnp.exp(-jnp.abs(z)))
        return jnp.sum(jnp.where(in_bounds, sp, 0.0), axis=0, keepdims=True)

    s3 = ce_lane_sum(dlcla_ref)
    s4 = ce_lane_sum(dcla_ref)

    out_ref[...] = jnp.concatenate(
        [s0, s1, s2, s3, s4, jnp.zeros((3, lanes), jnp.float32)], axis=0)[None]


def _as_plane(x, n_pad):
    """Flatten to 1-D (native dtype), zero-pad to a lane multiple only if needed,
    and view as a lane-dense (rows, 128) plane (the reshape itself is copy-free)."""
    x = x.reshape(-1)
    extra = n_pad - x.shape[0]
    if extra:
        x = jnp.pad(x, (0, extra))
    return x.reshape(-1, LANE)


@functools.partial(jax.jit, static_argnames=("lambda_weight",))
def multi_supervision_loss(out, y_cla_batch, y_reg_batch, lambda_weight=1.0):
    """JAX/Pallas equivalent of MultiSupervisionLoss.forward (no learned params)."""
    cla = out["cla"].reshape(-1, 2)
    lcla = out["lcla"].reshape(-1, 2)
    lreg = out["lreg"].reshape(-1)
    reg = out["reg"].reshape(-1)
    y_cla = y_cla_batch.reshape(-1)
    y_reg = y_reg_batch.reshape(-1)

    n = reg.shape[0]
    n_pad = ((n + LANE - 1) // LANE) * LANE
    rows = n_pad // LANE
    blk_rows = min(1024, rows)                       # ~6 MiB of double-buffered f32 tiles
    num_blocks = (rows + blk_rows - 1) // blk_rows

    # 2-class CE only needs the logit difference c1 - c0: one fused elementwise pass per
    # logits tensor instead of strided channel gathers, and half the logits HBM traffic.
    d_lcla = lcla[:, 1] - lcla[:, 0]
    d_cla = cla[:, 1] - cla[:, 0]

    planes = tuple(_as_plane(a, n_pad) for a in (y_reg, lreg, reg, y_cla, d_lcla, d_cla))

    partials = pl.pallas_call(
        functools.partial(_loss_partials_kernel, n_valid=n),
        out_shape=jax.ShapeDtypeStruct((num_blocks, 8, LANE), jnp.float32),
        grid=(num_blocks,),
        in_specs=[pl.BlockSpec((blk_rows, LANE), lambda i: (i, 0))] * 6,
        out_specs=pl.BlockSpec((1, 8, LANE), lambda i: (i, 0, 0)),
        compiler_params=pltpu.CompilerParams(dimension_semantics=("parallel",)),
    )(*planes)

    totals = jnp.sum(partials, axis=(0, 2))          # (8,) tiny final reduction in JAX
    lreg_sum, reg_sum, cnt, lcla_ce, cla_ce = (totals[k] for k in range(5))

    # masked_mae with NaN null_val == sum_valid |p - l| / count_valid (0 if all labels NaN).
    reg_loss = jnp.where(cnt > 0, (lreg_sum + reg_sum) / jnp.maximum(cnt, 1.0), 0.0)
    cla_loss = (lcla_ce + cla_ce) / n                # CrossEntropyLoss mean over N
    total_loss = reg_loss + lambda_weight * cla_loss
    return total_loss, reg_loss, cla_loss


if __name__ == "__main__":
    key = jax.random.PRNGKey(0)
    B, T, Nn = 2, 8, 16                              # N = B*T*Nn = 256 elements
    k = jax.random.split(key, 6)

    out = {
        "cla": jax.random.normal(k[0], (B, T, Nn, 2), jnp.float32),
        "lcla": jax.random.normal(k[1], (B, T, Nn, 2), jnp.float32),
        "reg": jax.random.normal(k[2], (B, T, Nn, 1), jnp.float32),
        "lreg": jax.random.normal(k[3], (B, T, Nn, 1), jnp.float32),
    }
    y_cla = (jax.random.uniform(k[4], (B, T, Nn)) > 0.5).astype(jnp.float32)
    y_reg = jax.random.normal(k[5], (B, T, Nn), jnp.float32)
    y_reg = y_reg.at[0, 0, :3].set(jnp.nan)          # exercise the masked-MAE path

    total, reg_loss, cla_loss = multi_supervision_loss(out, y_cla, y_reg, lambda_weight=1.0)
    jax.block_until_ready(total)
    print(f"Loss - Regression: {float(reg_loss):.4f}, Classification: {float(cla_loss):.4f}")

    # ---- pure-JAX reference (mirrors the PyTorch module exactly) ----
    def ref_masked_mae(p, l):
        mask = (~jnp.isnan(l)).astype(jnp.float32)
        mask = mask / jnp.mean(mask)
        mask = jnp.where(jnp.isnan(mask), 0.0, mask)
        loss = jnp.abs(p - l) * mask
        loss = jnp.where(jnp.isnan(loss), 0.0, loss)
        return jnp.mean(loss)

    def ref_ce(logits, labels):
        lse = jax.nn.logsumexp(logits, axis=-1)
        sel = jnp.take_along_axis(logits, labels[:, None], axis=-1)[:, 0]
        return jnp.mean(lse - sel)

    yr = y_reg.reshape(-1)
    yc = (y_cla.reshape(-1) == 1).astype(jnp.int32)
    ref_reg = ref_masked_mae(out["lreg"].reshape(-1), yr) + ref_masked_mae(out["reg"].reshape(-1), yr)
    ref_cla = ref_ce(out["lcla"].reshape(-1, 2), yc) + ref_ce(out["cla"].reshape(-1, 2), yc)
    ref_total = ref_reg + 1.0 * ref_cla
    assert abs(float(total) - float(ref_total)) < 1e-4, (float(total), float(ref_total))

    print("KERNEL_OK")
</pallas_src>

<mosaic_0001>
module attributes {stable_mosaic.version = 11 : i64} {
  func.func @_loss_partials_kernel(%arg0: i32, %arg1: memref<2x128xf32, #tpu.memory_space<vmem>>, %arg2: memref<2x128xf32, #tpu.memory_space<vmem>>, %arg3: memref<2x128xf32, #tpu.memory_space<vmem>>, %arg4: memref<2x128xf32, #tpu.memory_space<vmem>>, %arg5: memref<2x128xf32, #tpu.memory_space<vmem>>, %arg6: memref<2x128xf32, #tpu.memory_space<vmem>>, %arg7: memref<1x8x128xf32, #tpu.memory_space<vmem>>) attributes {dimension_semantics = [#tpu.dimension_semantics<parallel>], iteration_bounds = array<i64: 1>, scalar_prefetch = 0 : i64, scratch_operands = 0 : i64, tpu.core_type = #tpu.core_type<tc>, window_params = [{transform_indices = @transform_0, window_bounds = array<i64: 2, 128>}, {transform_indices = @transform_1, window_bounds = array<i64: 2, 128>}, {transform_indices = @transform_2, window_bounds = array<i64: 2, 128>}, {transform_indices = @transform_3, window_bounds = array<i64: 2, 128>}, {transform_indices = @transform_4, window_bounds = array<i64: 2, 128>}, {transform_indices = @transform_5, window_bounds = array<i64: 2, 128>}, {transform_indices = @transform_6, window_bounds = array<i64: 1, 8, 128>}]} {
    %0 = tpu.iota {dimensions = array<i32: 0>} : vector<2x128xi32>
    %1 = tpu.iota {dimensions = array<i32: 1>} : vector<2x128xi32>
    %c2_i32 = arith.constant 2 : i32
    %2 = arith.muli %arg0, %c2_i32 : i32
    %3 = vector.broadcast %2 : i32 to vector<2x128xi32>
    %4 = arith.addi %3, %0 : vector<2x128xi32>
    %c128_i32 = arith.constant 128 : i32
    %5 = vector.broadcast %c128_i32 : i32 to vector<2x128xi32>
    %6 = arith.muli %4, %5 : vector<2x128xi32>
    %7 = arith.addi %6, %1 : vector<2x128xi32>
    %c256_i32 = arith.constant 256 : i32
    %8 = vector.broadcast %c256_i32 : i32 to vector<2x128xi32>
    %9 = arith.cmpi slt, %7, %8 : vector<2x128xi32>
    %c0 = arith.constant 0 : index
    %c0_0 = arith.constant 0 : index
    %10 = vector.load %arg1[%c0, %c0_0] : memref<2x128xf32, #tpu.memory_space<vmem>>, vector<2x128xf32>
    %11 = arith.cmpf one, %10, %10 : vector<2x128xf32>
    %cst = arith.constant dense<true> : vector<2x128xi1>
    %12 = arith.xori %11, %cst : vector<2x128xi1>
    %13 = arith.andi %9, %12 : vector<2x128xi1>
    %cst_1 = arith.constant 0.000000e+00 : f32
    %14 = vector.broadcast %cst_1 : f32 to vector<2x128xf32>
    %15 = arith.select %13, %10, %14 : vector<2x128xi1>, vector<2x128xf32>
    %c0_2 = arith.constant 0 : index
    %c0_3 = arith.constant 0 : index
    %16 = vector.load %arg2[%c0_2, %c0_3] : memref<2x128xf32, #tpu.memory_space<vmem>>, vector<2x128xf32>
    %17 = arith.subf %16, %15 : vector<2x128xf32>
    %18 = math.absf %17 : vector<2x128xf32>
    %cst_4 = arith.constant 0.000000e+00 : f32
    %19 = vector.broadcast %cst_4 : f32 to vector<2x128xf32>
    %20 = arith.select %13, %18, %19 : vector<2x128xi1>, vector<2x128xf32>
    %c0_5 = arith.constant 0 : index
    %c0_6 = arith.constant 0 : index
    %21 = vector.load %arg3[%c0_5, %c0_6] : memref<2x128xf32, #tpu.memory_space<vmem>>, vector<2x128xf32>
    %22 = arith.subf %21, %15 : vector<2x128xf32>
    %23 = math.absf %22 : vector<2x128xf32>
    %cst_7 = arith.constant 0.000000e+00 : f32
    %24 = vector.broadcast %cst_7 : f32 to vector<2x128xf32>
    %25 = arith.select %13, %23, %24 : vector<2x128xi1>, vector<2x128xf32>
    %cst_8 = arith.constant dense<0.000000e+00> : vector<128xf32>
    %26 = vector.multi_reduction <add>, %20, %cst_8 [0] : vector<2x128xf32> to vector<128xf32>
    %27 = vector.shape_cast %26 : vector<128xf32> to vector<1x128xf32>
    %cst_9 = arith.constant dense<0.000000e+00> : vector<128xf32>
    %28 = vector.multi_reduction <add>, %25, %cst_9 [0] : vector<2x128xf32> to vector<128xf32>
    %29 = vector.shape_cast %28 : vector<128xf32> to vector<1x128xf32>
    %30 = arith.extui %13 : vector<2x128xi1> to vector<2x128xi32>
    %31 = arith.sitofp %30 : vector<2x128xi32> to vector<2x128xf32>
    %cst_10 = arith.constant dense<0.000000e+00> : vector<128xf32>
    %32 = vector.multi_reduction <add>, %31, %cst_10 [0] : vector<2x128xf32> to vector<128xf32>
    %33 = vector.shape_cast %32 : vector<128xf32> to vector<1x128xf32>
    %c0_11 = arith.constant 0 : index
    %c0_12 = arith.constant 0 : index
    %34 = vector.load %arg4[%c0_11, %c0_12] : memref<2x128xf32, #tpu.memory_space<vmem>>, vector<2x128xf32>
    %cst_13 = arith.constant 1.000000e+00 : f32
    %35 = vector.broadcast %cst_13 : f32 to vector<2x128xf32>
    %36 = arith.cmpf oeq, %34, %35 : vector<2x128xf32>
    %cst_14 = arith.constant -1.000000e+00 : f32
    %cst_15 = arith.constant 1.000000e+00 : f32
    %37 = vector.broadcast %cst_14 : f32 to vector<2x128xf32>
    %38 = vector.broadcast %cst_15 : f32 to vector<2x128xf32>
    %39 = arith.select %36, %37, %38 : vector<2x128xi1>, vector<2x128xf32>
    %c0_16 = arith.constant 0 : index
    %c0_17 = arith.constant 0 : index
    %40 = vector.load %arg5[%c0_16, %c0_17] : memref<2x128xf32, #tpu.memory_space<vmem>>, vector<2x128xf32>
    %41 = arith.mulf %39, %40 : vector<2x128xf32>
    %cst_18 = arith.constant 0.000000e+00 : f32
    %42 = vector.broadcast %cst_18 : f32 to vector<2x128xf32>
    %43 = arith.maximumf %41, %42 : vector<2x128xf32>
    %44 = math.absf %41 : vector<2x128xf32>
    %cst_19 = arith.constant 0.000000e+00 : f32
    %45 = vector.broadcast %cst_19 : f32 to vector<2x128xf32>
    %46 = arith.subf %45, %44 : vector<2x128xf32>
    %47 = math.exp %46 : vector<2x128xf32>
    %cst_20 = arith.constant 1.000000e+00 : f32
    %48 = vector.broadcast %cst_20 : f32 to vector<2x128xf32>
    %49 = arith.addf %48, %47 : vector<2x128xf32>
    %50 = math.log %49 : vector<2x128xf32>
    %51 = arith.addf %43, %50 : vector<2x128xf32>
    %cst_21 = arith.constant 0.000000e+00 : f32
    %52 = vector.broadcast %cst_21 : f32 to vector<2x128xf32>
    %53 = arith.select %9, %51, %52 : vector<2x128xi1>, vector<2x128xf32>
    %cst_22 = arith.constant dense<0.000000e+00> : vector<128xf32>
    %54 = vector.multi_reduction <add>, %53, %cst_22 [0] : vector<2x128xf32> to vector<128xf32>
    %55 = vector.shape_cast %54 : vector<128xf32> to vector<1x128xf32>
    %c0_23 = arith.constant 0 : index
    %c0_24 = arith.constant 0 : index
    %56 = vector.load %arg6[%c0_23, %c0_24] : memref<2x128xf32, #tpu.memory_space<vmem>>, vector<2x128xf32>
    %57 = arith.mulf %39, %56 : vector<2x128xf32>
    %cst_25 = arith.constant 0.000000e+00 : f32
    %58 = vector.broadcast %cst_25 : f32 to vector<2x128xf32>
    %59 = arith.maximumf %57, %58 : vector<2x128xf32>
    %60 = math.absf %57 : vector<2x128xf32>
    %cst_26 = arith.constant 0.000000e+00 : f32
    %61 = vector.broadcast %cst_26 : f32 to vector<2x128xf32>
    %62 = arith.subf %61, %60 : vector<2x128xf32>
    %63 = math.exp %62 : vector<2x128xf32>
    %cst_27 = arith.constant 1.000000e+00 : f32
    %64 = vector.broadcast %cst_27 : f32 to vector<2x128xf32>
    %65 = arith.addf %64, %63 : vector<2x128xf32>
    %66 = math.log %65 : vector<2x128xf32>
    %67 = arith.addf %59, %66 : vector<2x128xf32>
    %cst_28 = arith.constant 0.000000e+00 : f32
    %68 = vector.broadcast %cst_28 : f32 to vector<2x128xf32>
    %69 = arith.select %9, %67, %68 : vector<2x128xi1>, vector<2x128xf32>
    %cst_29 = arith.constant dense<0.000000e+00> : vector<128xf32>
    %70 = vector.multi_reduction <add>, %69, %cst_29 [0] : vector<2x128xf32> to vector<128xf32>
    %71 = vector.shape_cast %70 : vector<128xf32> to vector<1x128xf32>
    %cst_30 = arith.constant 0.000000e+00 : f32
    %72 = vector.broadcast %cst_30 : f32 to vector<3x128xf32>
    %73 = tpu.concatenate %27, %29, %33, %55, %71, %72 in 0 : vector<1x128xf32>, vector<1x128xf32>, vector<1x128xf32>, vector<1x128xf32>, vector<1x128xf32>, vector<3x128xf32> -> vector<8x128xf32>
    %74 = vector.shape_cast %73 : vector<8x128xf32> to vector<1x8x128xf32>
    %c0_31 = arith.constant 0 : index
    %c0_32 = arith.constant 0 : index
    %c0_33 = arith.constant 0 : index
    %75 = vector.load %arg7[%c0_31, %c0_32, %c0_33] : memref<1x8x128xf32, #tpu.memory_space<vmem>>, vector<1x8x128xf32>
    tpu.vector_store %arg7[%c0_31, %c0_32, %c0_33], %74 {strides = array<i32>} : memref<1x8x128xf32, #tpu.memory_space<vmem>>, vector<1x8x128xf32>,
    return
  }
  func.func @transform_0(%arg0: i32) -> (i32, i32) {
    %c0_i32 = arith.constant 0 : i32
    %c0_i32_0 = arith.constant 0 : i32
    return %arg0, %c0_i32 : i32, i32
  }
  func.func @transform_1(%arg0: i32) -> (i32, i32) {
    %c0_i32 = arith.constant 0 : i32
    %c0_i32_0 = arith.constant 0 : i32
    return %arg0, %c0_i32 : i32, i32
  }
  func.func @transform_2(%arg0: i32) -> (i32, i32) {
    %c0_i32 = arith.constant 0 : i32
    %c0_i32_0 = arith.constant 0 : i32
    return %arg0, %c0_i32 : i32, i32
  }
  func.func @transform_3(%arg0: i32) -> (i32, i32) {
    %c0_i32 = arith.constant 0 : i32
    %c0_i32_0 = arith.constant 0 : i32
    return %arg0, %c0_i32 : i32, i32
  }
  func.func @transform_4(%arg0: i32) -> (i32, i32) {
    %c0_i32 = arith.constant 0 : i32
    %c0_i32_0 = arith.constant 0 : i32
    return %arg0, %c0_i32 : i32, i32
  }
  func.func @transform_5(%arg0: i32) -> (i32, i32) {
    %c0_i32 = arith.constant 0 : i32
    %c0_i32_0 = arith.constant 0 : i32
    return %arg0, %c0_i32 : i32, i32
  }
  func.func @transform_6(%arg0: i32) -> (i32, i32, i32) {
    %c0_i32 = arith.constant 0 : i32
    %c0_i32_0 = arith.constant 0 : i32
    %c0_i32_1 = arith.constant 0 : i32
    return %arg0, %c0_i32, %c0_i32_0 : i32, i32, i32
  }
}

</mosaic_0001>

<bundles_post_ra>
// kernel: multi_supervision_loss.1
= control target key start
LH: loop header
LB: loop body
LE: loop exit
PB: predicated region body
PF: predicated region fallthrough
CT: control target
= control target key end

     0   :  { %v23_v0 = vlaneseq  ;;  %v137_v8 = vmov 1.0   ;;  %vm138_vm2 = vmmov 1   ;;  %vm46_vm6 = vcmask 1041408   ;;  %s217_s0 = inlined_call_operand.vmem [shape: f32[2,128], index: 0, kind: input, shape index: {}]   ;;  %s218_s3 = inlined_call_operand.vmem [shape: f32[2,128], index: 3, kind: input, shape index: {}]   ;;  %s219_s4 = inlined_call_operand.vmem [shape: f32[2,128], index: 4, kind: input, shape index: {}]   ;;  %s220_s5 = inlined_call_operand.vmem [shape: f32[2,128], index: 5, kind: input, shape index: {}]   ;;  %s221_s1 = inlined_call_operand.vmem [shape: f32[2,128], index: 1, kind: input, shape index: {}]   ;;  %s222_s2 = inlined_call_operand.vmem [shape: f32[2,128], index: 2, kind: input, shape index: {}]   ;;  %s223_s6 = inlined_call_operand.vmem [shape: f32[1,8,128], index: 6, kind: output, shape index: {}]  }
   0x1   :  { %v33_v1 = vld [vmem:[%s217_s0] sm:$0x3]  ;;  %v139_v27 = vmov 0.0   ;;  %vm111_vm7 = vcmask 1040384   ;;  %vm114_vm8 = vcmask 1042432   ;;  %vm116_vm9 = vcmask 1043456  }
   0x2   :  { %v24_v2 = vshrl.u32 %v23_v0, 7  ;;  %v26_v3 = vand.u32 127, %v23_v0  ;;  %v70_v4 = vld [vmem:[%s218_s3] sm:$0x3]  ;;  %vm34_vm0 = vcmp.ne.f32.partialorder %v33_v1, %v33_v1  ;;  %vm118_vm10 = vcmask 1044480  }
   0x3   :  { %vm71_vm1 = vcmp.eq.f32.partialorder %v70_v4, 1.0  ;;  %v73_v5 = vld [vmem:[%s219_s4] sm:$0x3]  ;;  %vm35_vm3 = vmxor %vm34_vm0, %vm138_vm2 }
   0x4   :  { %v92_v6 = vld [vmem:[%s220_s5] sm:$0x3]  ;;  %v30_v7 = vmul.u32 128, %v24_v2  ;;  %v72_v9 = vsel %vm71_vm1, -1.0, %v137_v8 }
   0x5   :  { %v74_v10 = vmul.f32 %v73_v5, %v72_v9  ;;  %v93_v11 = vmul.f32 %v92_v6, %v72_v9  ;;  %v38_v15 = vld [vmem:[%s221_s1] sm:$0x3] }
   0x6   :  { %v31_v12 = vadd.s32 %v30_v7, %v26_v3  ;;  %v42_v16 = vld [vmem:[%s222_s2] sm:$0x3] }
   0x7   :  { %v76_v13 = vand.u32 2147483647, %v74_v10  ;;  %v95_v14 = vand.u32 2147483647, %v93_v11  ;;  %v75_v46 = vmax.f32 %v74_v10, 0.0  ;;  %v94_v49 = vmax.f32 %v93_v11, 0.0 }
   0x8   :  { %vm32_vm4 = vcmp.lt.s32.totalorder %v31_v12, 256 }
   0x9   :  { %vm194_vm5 = vmand %vm32_vm4, %vm35_vm3  ;;  %v77_v18 = vsub.f32 0.0, %v76_v13  ;;  %v96_v19 = vsub.f32 0.0, %v95_v14 }
   0xa   :  { %v37_v20 = vsel %vm194_vm5, %v33_v1, 0.0  ;;  %v125_v28 = vsel %vm194_vm5, 1.0, %v139_v27 }
   0xb   :  { %v39_v21 = vsub.f32 %v38_v15, %v37_v20  ;;  %v43_v22 = vsub.f32 %v42_v16, %v37_v20  ;;  %v78_v23 = vmul.f32 1.442695, %v77_v18  ;;  %v97_v24 = vmul.f32 1.442695, %v96_v19 }
   0xc   :  { %v63_v35 = vsel %vm46_vm6, %v125_v28, 0.0 }
   0xd   :  { %v40_v25 = vand.u32 2147483647, %v39_v21  ;;  %v44_v26 = vand.u32 2147483647, %v43_v22  ;;  %129 = vpow2.f32 %v78_v23  ;;  %v64_v38 = vrot.slane %v63_v35, 4 }
   0xe   :  { %131 = vpow2.f32 %v97_v24 }
   0xf   :  { %v41_v29 = vsel %vm194_vm5, %v40_v25, 0.0  ;;  %v45_v30 = vsel %vm194_vm5, %v44_v26, 0.0  ;;  %v65_v43 = vadd.f32 %v64_v38, %v63_v35 }
  0x10   :  { %v47_v31 = vsel %vm46_vm6, %v41_v29, 0.0  ;;  %v54_v32 = vsel %vm46_vm6, %v45_v30, 0.0 }
  0x11   :  { %v48_v33 = vrot.slane %v47_v31, 4  ;;  %v55_v34 = vrot.slane %v54_v32, 4  ;;  %v66_v48 = vrot.slane %v65_v43, 2 }
  0x13   :  { %v130_v36 = vpop.eup %129  ;;  %v49_v40 = vadd.f32 %v48_v33, %v47_v31  ;;  %v56_v41 = vadd.f32 %v55_v34, %v54_v32  ;;  %v67_v56 = vadd.f32 %v66_v48, %v65_v43 }
  0x14   :  { %v132_v37 = vpop.eup %131  ;;  %v80_v39 = vadd.f32 1.0, %v130_v36 }
  0x15   :  { %v99_v42 = vadd.f32 1.0, %v132_v37  ;;  %v50_v44 = vrot.slane %v49_v40, 2  ;;  %v57_v45 = vrot.slane %v56_v41, 2  ;;  %v68_v1 = vrot.slane %v67_v56, 1 }
  0x16   :  { %133 = vlog2.f32 %v80_v39 }
  0x17   :  { %135 = vlog2.f32 %v99_v42  ;;  %v51_v51 = vadd.f32 %v50_v44, %v49_v40  ;;  %v58_v52 = vadd.f32 %v57_v45, %v56_v41  ;;  %v69_v8 = vadd.f32 %v68_v1, %v67_v56 }
  0x19   :  { %v52_v58 = vrot.slane %v51_v51, 1  ;;  %v59_v59 = vrot.slane %v58_v52, 1 }
  0x1b   :  { %v53_v3 = vadd.f32 %v52_v58, %v51_v51  ;;  %v60_v4 = vadd.f32 %v59_v59, %v58_v52 }
  0x1c   :  { %v134_v47 = vpop.eup %133 }
  0x1d   :  { %v136_v50 = vpop.eup %135  ;;  %v82_v53 = vmul.f32 0.6931472, %v134_v47  ;;  %v112_v11 = vsel %vm111_vm7, %v53_v3, %v60_v4 }
  0x1e   :  { %v101_v54 = vmul.f32 0.6931472, %v136_v50  ;;  %v113_v12 = vsel %vm46_vm6, %v112_v11, %v69_v8 }
  0x1f   :  { %v83_v55 = vadd.f32 %v82_v53, %v75_v46 }
  0x20   :  { %v102_v57 = vadd.f32 %v101_v54, %v94_v49 }
  0x21   :  { %v84_v60 = vsel %vm32_vm4, %v83_v55, 0.0 }
  0x22   :  { %v85_v61 = vsel %vm46_vm6, %v84_v60, 0.0  ;;  %v103_v62 = vsel %vm32_vm4, %v102_v57, 0.0 }
  0x23   :  { %v86_v63 = vrot.slane %v85_v61, 4  ;;  %v104_v0 = vsel %vm46_vm6, %v103_v62, 0.0 }
  0x24   :  { %v105_v2 = vrot.slane %v104_v0, 4 }
  0x25   :  { %v87_v5 = vadd.f32 %v86_v63, %v85_v61 }
  0x26   :  { %v106_v6 = vadd.f32 %v105_v2, %v104_v0 }
  0x27   :  { %v88_v7 = vrot.slane %v87_v5, 2 }
  0x28   :  { %v107_v9 = vrot.slane %v106_v6, 2 }
  0x29   :  { %v89_v10 = vadd.f32 %v88_v7, %v87_v5 }
  0x2a   :  { %v108_v13 = vadd.f32 %v107_v9, %v106_v6 }
  0x2b   :  { %v90_v14 = vrot.slane %v89_v10, 1 }
  0x2c   :  { %v109_v15 = vrot.slane %v108_v13, 1 }
  0x2d   :  { %v91_v16 = vadd.f32 %v90_v14, %v89_v10 }
  0x2e   :  { %v110_v17 = vadd.f32 %v109_v15, %v108_v13 }
  0x2f   :  { %v115_v18 = vsel %vm114_vm8, %v113_v12, %v91_v16 }
  0x30   :  { %v117_v19 = vsel %vm116_vm9, %v115_v18, %v110_v17 }
  0x31   :  { %v119_v20 = vsel %vm118_vm10, %v117_v19, 0.0 }
  0x32   :  { %120 = vst [vmem:[%s223_s6] sm:$0xff] %v119_v20 }

</bundles_post_ra>
